<compile_context>
chip_gen: v5e
topology: v5e:2x2
jax: 0.10.0
libtpu: 0.0.40
codegen_flags: <defaults>
</compile_context>

<pallas_src>
import functools

import jax
import jax.numpy as jnp
from jax.experimental import pallas as pl
from jax.experimental.pallas import tpu as pltpu

EDGE_THRESHOLD = 5


def _pick_channel_tile(c, target=64):
    """Largest divisor of c that is <= target (c itself if c <= target)."""
    if c <= target:
        return c
    best = 1
    for tc in range(1, target + 1):
        if c % tc == 0:
            best = tc
    return best


def hard_detection_kernel(x_ref, dwm_ref, o_ref, pad_ref, *, edge_threshold):
    # x_ref  : (1, tc, H, W)  input channel tile
    # dwm_ref: (1, 1,  H, W)  per-sample depth-wise (channel) max
    # o_ref  : (1, tc, H, W)  int8 detection mask
    # pad_ref: (tc, H+2, W+2) f32 VMEM scratch (halo buffer)
    x = x_ref[0].astype(jnp.float32)            # (tc, H, W)
    tc, h, w = x.shape

    # --- build the -inf-padded halo buffer in VMEM -------------------------
    pad_ref[...] = jnp.full((tc, h + 2, w + 2), -jnp.inf, jnp.float32)
    pad_ref[:, 1:h + 1, 1:w + 1] = x

    # --- 8 shifted neighbor views (image border carries -inf) --------------
    n_u = pad_ref[:, 0:h, 1:w + 1]       # x[i-1, j  ]
    n_d = pad_ref[:, 2:h + 2, 1:w + 1]   # x[i+1, j  ]
    n_l = pad_ref[:, 1:h + 1, 0:w]       # x[i  , j-1]
    n_r = pad_ref[:, 1:h + 1, 2:w + 2]   # x[i  , j+1]
    n_ul = pad_ref[:, 0:h, 0:w]
    n_ur = pad_ref[:, 0:h, 2:w + 2]
    n_dl = pad_ref[:, 2:h + 2, 0:w]
    n_dr = pad_ref[:, 2:h + 2, 2:w + 2]

    # --- 3x3 local max-pool, stride 1, -inf padding (matches F.max_pool2d) --
    local_max = x
    for n in (n_u, n_d, n_l, n_r, n_ul, n_ur, n_dl, n_dr):
        local_max = jnp.maximum(local_max, n)
    is_local_max = x == local_max

    # --- depth-wise (channel) maximum --------------------------------------
    dwm = dwm_ref[0].astype(jnp.float32)         # (1, H, W) -> broadcasts
    is_depth_wise_max = x == dwm

    # --- second-derivative filters (cross-correlation, ZERO padding) -------
    # Reuse the same neighbor loads; swap the -inf border for the zero border
    # required by conv2d(padding=1) via cheap VPU masks.
    row = jax.lax.broadcasted_iota(jnp.int32, (tc, h, w), 1)
    col = jax.lax.broadcasted_iota(jnp.int32, (tc, h, w), 2)
    top, bot = row == 0, row == h - 1
    lft, rgt = col == 0, col == w - 1

    x_u = jnp.where(top, 0.0, n_u)
    x_d = jnp.where(bot, 0.0, n_d)
    x_l = jnp.where(lft, 0.0, n_l)
    x_r = jnp.where(rgt, 0.0, n_r)
    x_ul = jnp.where(top | lft, 0.0, n_ul)
    x_ur = jnp.where(top | rgt, 0.0, n_ur)
    x_dl = jnp.where(bot | lft, 0.0, n_dl)
    x_dr = jnp.where(bot | rgt, 0.0, n_dr)

    dii = x_u - 2.0 * x + x_d            # [0,1,0; 0,-2,0; 0,1,0]
    djj = x_l - 2.0 * x + x_r            # [0,0,0; 1,-2,1; 0,0,0]
    dij = 0.25 * (x_ul - x_ur - x_dl + x_dr)

    det = dii * djj - dij * dij
    tr = dii + djj
    threshold = (edge_threshold + 1) ** 2 / edge_threshold
    # Division-free edge test: equivalent to (tr*tr/det <= thr) & (det > 0).
    is_not_edge = jnp.logical_and(tr * tr <= threshold * det, det > 0)

    detected = jnp.logical_and(is_depth_wise_max,
                               jnp.logical_and(is_local_max, is_not_edge))
    o_ref[0] = detected.astype(jnp.int8)


def hard_detection(x, edge_threshold=EDGE_THRESHOLD):
    b, c, h, w = x.shape
    # Cheap (B,1,H,W) channel-max side input (decouples channel tiling from
    # the depth-wise max).  Computed in the input dtype; upcast in-kernel.
    dwm = jnp.max(x, axis=1, keepdims=True)

    tc = _pick_channel_tile(c)
    kernel = functools.partial(hard_detection_kernel,
                               edge_threshold=edge_threshold)
    out = pl.pallas_call(
        kernel,
        out_shape=jax.ShapeDtypeStruct((b, c, h, w), jnp.int8),
        grid=(b, c // tc),
        in_specs=[
            pl.BlockSpec((1, tc, h, w), lambda i, j: (i, j, 0, 0)),
            pl.BlockSpec((1, 1, h, w), lambda i, j: (i, 0, 0, 0)),
        ],
        out_specs=pl.BlockSpec((1, tc, h, w), lambda i, j: (i, j, 0, 0)),
        scratch_shapes=[pltpu.VMEM((tc, h + 2, w + 2), jnp.float32)],
        compiler_params=pltpu.CompilerParams(
            dimension_semantics=("parallel", "parallel")),
    )(x, dwm)
    # TODO(synk): bool-typed Pallas outputs are flaky on some Mosaic versions,
    # so the kernel writes int8 and we view it as bool here (1-byte cast pass).
    return out.astype(jnp.bool_)


def hard_detection_ref(x, edge_threshold=EDGE_THRESHOLD):
    """Pure-JAX reference (same arithmetic, per-sample depth-wise max)."""
    x = x.astype(jnp.float32)
    b, c, h, w = x.shape
    xz = jnp.pad(x, ((0, 0), (0, 0), (1, 1), (1, 1)), constant_values=0.0)
    xm = jnp.pad(x, ((0, 0), (0, 0), (1, 1), (1, 1)),
                 constant_values=-jnp.inf)

    dwm = jnp.max(x, axis=1, keepdims=True)
    is_dwm = x == dwm

    local_max = jnp.full_like(x, -jnp.inf)
    for di in range(3):
        for dj in range(3):
            local_max = jnp.maximum(local_max,
                                    xm[:, :, di:di + h, dj:dj + w])
    is_lm = x == local_max

    x_u = xz[:, :, 0:h, 1:w + 1]
    x_d = xz[:, :, 2:h + 2, 1:w + 1]
    x_l = xz[:, :, 1:h + 1, 0:w]
    x_r = xz[:, :, 1:h + 1, 2:w + 2]
    x_ul = xz[:, :, 0:h, 0:w]
    x_ur = xz[:, :, 0:h, 2:w + 2]
    x_dl = xz[:, :, 2:h + 2, 0:w]
    x_dr = xz[:, :, 2:h + 2, 2:w + 2]

    dii = x_u - 2.0 * x + x_d
    djj = x_l - 2.0 * x + x_r
    dij = 0.25 * (x_ul - x_ur - x_dl + x_dr)

    det = dii * djj - dij * dij
    tr = dii + djj
    threshold = (edge_threshold + 1) ** 2 / edge_threshold
    # Same division-free form as the kernel (equivalent to torch's
    # tr*tr/det <= threshold given the det > 0 conjunct).
    is_not_edge = jnp.logical_and(tr * tr <= threshold * det, det > 0)
    return jnp.logical_and(is_dwm, jnp.logical_and(is_lm, is_not_edge))


if __name__ == "__main__":
    key = jax.random.PRNGKey(0)
    x = jax.random.normal(key, (2, 4, 16, 16), dtype=jnp.float32)

    out = hard_detection(x)
    out = jax.block_until_ready(out)

    ref = hard_detection_ref(x)
    assert out.shape == (2, 4, 16, 16)
    assert out.dtype == jnp.bool_
    assert bool(jnp.array_equal(out, ref)), "mismatch vs pure-JAX reference"
    print("KERNEL_OK")
</pallas_src>

<mosaic_0001>
module attributes {stable_mosaic.version = 11 : i64} {
  func.func @hard_detection_kernel(%arg0: i32, %arg1: i32, %arg2: memref<1x4x16x16xf32, #tpu.memory_space<vmem>>, %arg3: memref<1x1x16x16xf32, #tpu.memory_space<vmem>>, %arg4: memref<1x4x16x16xi8, #tpu.memory_space<vmem>>, %arg5: memref<4x18x18xf32, #tpu.memory_space<vmem>>) attributes {dimension_semantics = [#tpu.dimension_semantics<parallel>, #tpu.dimension_semantics<parallel>], iteration_bounds = array<i64: 2, 1>, scalar_prefetch = 0 : i64, scratch_operands = 1 : i64, tpu.core_type = #tpu.core_type<tc>, window_params = [{transform_indices = @transform_0, window_bounds = array<i64: 1, 4, 16, 16>}, {transform_indices = @transform_1, window_bounds = array<i64: 1, 1, 16, 16>}, {transform_indices = @transform_2, window_bounds = array<i64: 1, 4, 16, 16>}]} {
    %c0 = arith.constant 0 : index
    %c0_0 = arith.constant 0 : index
    %c0_1 = arith.constant 0 : index
    %c0_2 = arith.constant 0 : index
    %0 = vector.load %arg2[%c0, %c0_0, %c0_1, %c0_2] : memref<1x4x16x16xf32, #tpu.memory_space<vmem>>, vector<1x4x16x16xf32>
    %1 = vector.shape_cast %0 : vector<1x4x16x16xf32> to vector<4x16x16xf32>
    %cst = arith.constant 0xFF800000 : f32
    %2 = vector.broadcast %cst : f32 to vector<4x18x18xf32>
    %c0_3 = arith.constant 0 : index
    %c0_4 = arith.constant 0 : index
    %c0_5 = arith.constant 0 : index
    %3 = vector.load %arg5[%c0_3, %c0_4, %c0_5] : memref<4x18x18xf32, #tpu.memory_space<vmem>>, vector<4x18x18xf32>
    tpu.vector_store %arg5[%c0_3, %c0_4, %c0_5], %2 {strides = array<i32>} : memref<4x18x18xf32, #tpu.memory_space<vmem>>, vector<4x18x18xf32>,
    %c0_6 = arith.constant 0 : index
    %c1 = arith.constant 1 : index
    %c1_7 = arith.constant 1 : index
    %4 = vector.load %arg5[%c0_6, %c1, %c1_7] : memref<4x18x18xf32, #tpu.memory_space<vmem>>, vector<4x16x16xf32>
    tpu.vector_store %arg5[%c0_6, %c1, %c1_7], %1 {strides = array<i32>} : memref<4x18x18xf32, #tpu.memory_space<vmem>>, vector<4x16x16xf32>,
    %c0_8 = arith.constant 0 : index
    %c0_9 = arith.constant 0 : index
    %c1_10 = arith.constant 1 : index
    %5 = vector.load %arg5[%c0_8, %c0_9, %c1_10] : memref<4x18x18xf32, #tpu.memory_space<vmem>>, vector<4x16x16xf32>
    %c0_11 = arith.constant 0 : index
    %c2 = arith.constant 2 : index
    %c1_12 = arith.constant 1 : index
    %6 = vector.load %arg5[%c0_11, %c2, %c1_12] : memref<4x18x18xf32, #tpu.memory_space<vmem>>, vector<4x16x16xf32>
    %c0_13 = arith.constant 0 : index
    %c1_14 = arith.constant 1 : index
    %c0_15 = arith.constant 0 : index
    %7 = vector.load %arg5[%c0_13, %c1_14, %c0_15] : memref<4x18x18xf32, #tpu.memory_space<vmem>>, vector<4x16x16xf32>
    %c0_16 = arith.constant 0 : index
    %c1_17 = arith.constant 1 : index
    %c2_18 = arith.constant 2 : index
    %8 = vector.load %arg5[%c0_16, %c1_17, %c2_18] : memref<4x18x18xf32, #tpu.memory_space<vmem>>, vector<4x16x16xf32>
    %c0_19 = arith.constant 0 : index
    %c0_20 = arith.constant 0 : index
    %c0_21 = arith.constant 0 : index
    %9 = vector.load %arg5[%c0_19, %c0_20, %c0_21] : memref<4x18x18xf32, #tpu.memory_space<vmem>>, vector<4x16x16xf32>
    %c0_22 = arith.constant 0 : index
    %c0_23 = arith.constant 0 : index
    %c2_24 = arith.constant 2 : index
    %10 = vector.load %arg5[%c0_22, %c0_23, %c2_24] : memref<4x18x18xf32, #tpu.memory_space<vmem>>, vector<4x16x16xf32>
    %c0_25 = arith.constant 0 : index
    %c2_26 = arith.constant 2 : index
    %c0_27 = arith.constant 0 : index
    %11 = vector.load %arg5[%c0_25, %c2_26, %c0_27] : memref<4x18x18xf32, #tpu.memory_space<vmem>>, vector<4x16x16xf32>
    %c0_28 = arith.constant 0 : index
    %c2_29 = arith.constant 2 : index
    %c2_30 = arith.constant 2 : index
    %12 = vector.load %arg5[%c0_28, %c2_29, %c2_30] : memref<4x18x18xf32, #tpu.memory_space<vmem>>, vector<4x16x16xf32>
    %13 = arith.maximumf %1, %5 : vector<4x16x16xf32>
    %14 = arith.maximumf %13, %6 : vector<4x16x16xf32>
    %15 = arith.maximumf %14, %7 : vector<4x16x16xf32>
    %16 = arith.maximumf %15, %8 : vector<4x16x16xf32>
    %17 = arith.maximumf %16, %9 : vector<4x16x16xf32>
    %18 = arith.maximumf %17, %10 : vector<4x16x16xf32>
    %19 = arith.maximumf %18, %11 : vector<4x16x16xf32>
    %20 = arith.maximumf %19, %12 : vector<4x16x16xf32>
    %21 = arith.cmpf oeq, %1, %20 : vector<4x16x16xf32>
    %c0_31 = arith.constant 0 : index
    %c0_32 = arith.constant 0 : index
    %c0_33 = arith.constant 0 : index
    %c0_34 = arith.constant 0 : index
    %22 = vector.load %arg3[%c0_31, %c0_32, %c0_33, %c0_34] : memref<1x1x16x16xf32, #tpu.memory_space<vmem>>, vector<1x1x16x16xf32>
    %23 = vector.shape_cast %22 : vector<1x1x16x16xf32> to vector<1x16x16xf32>
    %24 = vector.broadcast %23 : vector<1x16x16xf32> to vector<4x16x16xf32>
    %25 = arith.cmpf oeq, %1, %24 : vector<4x16x16xf32>
    %26 = tpu.iota {dimensions = array<i32: 1>} : vector<4x16x16xi32>
    %27 = tpu.iota {dimensions = array<i32: 2>} : vector<4x16x16xi32>
    %c0_i32 = arith.constant 0 : i32
    %28 = vector.broadcast %c0_i32 : i32 to vector<4x16x16xi32>
    %29 = arith.cmpi eq, %26, %28 : vector<4x16x16xi32>
    %c15_i32 = arith.constant 15 : i32
    %30 = vector.broadcast %c15_i32 : i32 to vector<4x16x16xi32>
    %31 = arith.cmpi eq, %26, %30 : vector<4x16x16xi32>
    %c0_i32_35 = arith.constant 0 : i32
    %32 = vector.broadcast %c0_i32_35 : i32 to vector<4x16x16xi32>
    %33 = arith.cmpi eq, %27, %32 : vector<4x16x16xi32>
    %c15_i32_36 = arith.constant 15 : i32
    %34 = vector.broadcast %c15_i32_36 : i32 to vector<4x16x16xi32>
    %35 = arith.cmpi eq, %27, %34 : vector<4x16x16xi32>
    %cst_37 = arith.constant 0.000000e+00 : f32
    %36 = vector.broadcast %cst_37 : f32 to vector<4x16x16xf32>
    %37 = arith.select %29, %36, %5 : vector<4x16x16xi1>, vector<4x16x16xf32>
    %cst_38 = arith.constant 0.000000e+00 : f32
    %38 = vector.broadcast %cst_38 : f32 to vector<4x16x16xf32>
    %39 = arith.select %31, %38, %6 : vector<4x16x16xi1>, vector<4x16x16xf32>
    %cst_39 = arith.constant 0.000000e+00 : f32
    %40 = vector.broadcast %cst_39 : f32 to vector<4x16x16xf32>
    %41 = arith.select %33, %40, %7 : vector<4x16x16xi1>, vector<4x16x16xf32>
    %cst_40 = arith.constant 0.000000e+00 : f32
    %42 = vector.broadcast %cst_40 : f32 to vector<4x16x16xf32>
    %43 = arith.select %35, %42, %8 : vector<4x16x16xi1>, vector<4x16x16xf32>
    %44 = arith.ori %29, %33 : vector<4x16x16xi1>
    %cst_41 = arith.constant 0.000000e+00 : f32
    %45 = vector.broadcast %cst_41 : f32 to vector<4x16x16xf32>
    %46 = arith.select %44, %45, %9 : vector<4x16x16xi1>, vector<4x16x16xf32>
    %47 = arith.ori %29, %35 : vector<4x16x16xi1>
    %cst_42 = arith.constant 0.000000e+00 : f32
    %48 = vector.broadcast %cst_42 : f32 to vector<4x16x16xf32>
    %49 = arith.select %47, %48, %10 : vector<4x16x16xi1>, vector<4x16x16xf32>
    %50 = arith.ori %31, %33 : vector<4x16x16xi1>
    %cst_43 = arith.constant 0.000000e+00 : f32
    %51 = vector.broadcast %cst_43 : f32 to vector<4x16x16xf32>
    %52 = arith.select %50, %51, %11 : vector<4x16x16xi1>, vector<4x16x16xf32>
    %53 = arith.ori %31, %35 : vector<4x16x16xi1>
    %cst_44 = arith.constant 0.000000e+00 : f32
    %54 = vector.broadcast %cst_44 : f32 to vector<4x16x16xf32>
    %55 = arith.select %53, %54, %12 : vector<4x16x16xi1>, vector<4x16x16xf32>
    %cst_45 = arith.constant 2.000000e+00 : f32
    %56 = vector.broadcast %cst_45 : f32 to vector<4x16x16xf32>
    %57 = arith.mulf %56, %1 : vector<4x16x16xf32>
    %58 = arith.subf %37, %57 : vector<4x16x16xf32>
    %59 = arith.addf %58, %39 : vector<4x16x16xf32>
    %cst_46 = arith.constant 2.000000e+00 : f32
    %60 = vector.broadcast %cst_46 : f32 to vector<4x16x16xf32>
    %61 = arith.mulf %60, %1 : vector<4x16x16xf32>
    %62 = arith.subf %41, %61 : vector<4x16x16xf32>
    %63 = arith.addf %62, %43 : vector<4x16x16xf32>
    %64 = arith.subf %46, %49 : vector<4x16x16xf32>
    %65 = arith.subf %64, %52 : vector<4x16x16xf32>
    %66 = arith.addf %65, %55 : vector<4x16x16xf32>
    %cst_47 = arith.constant 2.500000e-01 : f32
    %67 = vector.broadcast %cst_47 : f32 to vector<4x16x16xf32>
    %68 = arith.mulf %67, %66 : vector<4x16x16xf32>
    %69 = arith.mulf %59, %63 : vector<4x16x16xf32>
    %70 = arith.mulf %68, %68 : vector<4x16x16xf32>
    %71 = arith.subf %69, %70 : vector<4x16x16xf32>
    %72 = arith.addf %59, %63 : vector<4x16x16xf32>
    %73 = arith.mulf %72, %72 : vector<4x16x16xf32>
    %cst_48 = arith.constant 7.1999998 : f32
    %74 = vector.broadcast %cst_48 : f32 to vector<4x16x16xf32>
    %75 = arith.mulf %74, %71 : vector<4x16x16xf32>
    %76 = arith.cmpf ole, %73, %75 : vector<4x16x16xf32>
    %cst_49 = arith.constant 0.000000e+00 : f32
    %77 = vector.broadcast %cst_49 : f32 to vector<4x16x16xf32>
    %78 = arith.cmpf ogt, %71, %77 : vector<4x16x16xf32>
    %79 = arith.andi %76, %78 : vector<4x16x16xi1>
    %80 = arith.andi %21, %79 : vector<4x16x16xi1>
    %81 = arith.andi %25, %80 : vector<4x16x16xi1>
    %82 = arith.extui %81 : vector<4x16x16xi1> to vector<4x16x16xi8>
    %c0_50 = arith.constant 0 : index
    %c0_51 = arith.constant 0 : index
    %c0_52 = arith.constant 0 : index
    %c0_53 = arith.constant 0 : index
    %83 = vector.load %arg4[%c0_50, %c0_51, %c0_52, %c0_53] : memref<1x4x16x16xi8, #tpu.memory_space<vmem>>, vector<1x4x16x16xi8>
    %84 = vector.shape_cast %83 : vector<1x4x16x16xi8> to vector<4x16x16xi8>
    %85 = vector.shape_cast %82 : vector<4x16x16xi8> to vector<1x4x16x16xi8>
    tpu.vector_store %arg4[%c0_50, %c0_51, %c0_52, %c0_53], %85 {strides = array<i32>} : memref<1x4x16x16xi8, #tpu.memory_space<vmem>>, vector<1x4x16x16xi8>,
    return
  }
  func.func @transform_0(%arg0: i32, %arg1: i32) -> (i32, i32, i32, i32) {
    %c0_i32 = arith.constant 0 : i32
    %c0_i32_0 = arith.constant 0 : i32
    %c0_i32_1 = arith.constant 0 : i32
    return %arg0, %arg1, %c0_i32, %c0_i32_0 : i32, i32, i32, i32
  }
  func.func @transform_1(%arg0: i32, %arg1: i32) -> (i32, i32, i32, i32) {
    %c0_i32 = arith.constant 0 : i32
    %c0_i32_0 = arith.constant 0 : i32
    %c0_i32_1 = arith.constant 0 : i32
    %c0_i32_2 = arith.constant 0 : i32
    return %arg0, %c0_i32, %c0_i32_0, %c0_i32_1 : i32, i32, i32, i32
  }
  func.func @transform_2(%arg0: i32, %arg1: i32) -> (i32, i32, i32, i32) {
    %c0_i32 = arith.constant 0 : i32
    %c0_i32_0 = arith.constant 0 : i32
    %c0_i32_1 = arith.constant 0 : i32
    return %arg0, %arg1, %c0_i32, %c0_i32_0 : i32, i32, i32, i32
  }
}

</mosaic_0001>

<bundles_post_ra>
// kernel: tpu_custom_call.1
= control target key start
LH: loop header
LB: loop body
LE: loop exit
PB: predicated region body
PF: predicated region fallthrough
CT: control target
= control target key end

     0   :  { %7 = vsyncpa [#allocation4], 0  ;;  %s2185_s0 = inlined_call_operand.hbm [shape: f32[2,4,16,16], index: 0, kind: input, shape index: {}]   ;;  %s2186_s1 = inlined_call_operand.hbm [shape: f32[2,1,16,16], index: 1, kind: input, shape index: {}]   ;;  %s2187_s2 = inlined_call_operand.hbm [shape: s8[2,4,16,16], index: 2, kind: output, shape index: {}]  }
   0x1   :  { %9 = vsyncpa [#allocation4 + $0x1], 0 }
   0x2   :  { %10 = vsyncpa [#allocation7], 0 }
   0x3   :  { %12 = vsyncpa [#allocation7 + $0x1], 0 }
   0x4   :  { %13 = vsyncpa [#allocation5], 0 }
   0x5   :  { %15 = vsyncpa [#allocation5 + $0x1], 0  ;;  %s1373_s9 = smov 0   ;;  %s1375_s10 = smov 0  }
   0x6   :  { %s1377_s11 = smov 0   ;;  %s1379_s12 = smov 0  }
   0x7   :  { %s1381_s13 = smov 0   ;;  %s1383_s14 = smov 0  }
   0x8 LB: > { %s1099_s15 = sadd.s32 4294967295, %s1347_s14   ;;  %s1100_s16 = sadd.s32 4294967294, %s1347_s14   ;;  %s1347_s14 = sphi %s1383_s14, %s21_s14   ;;  %s1343_s13 = sphi %s1381_s13, %s2221_s13   ;;  %s1339_s12 = sphi %s1379_s12, %s2220_s12   ;;  %s1335_s11 = sphi %s1377_s11, %s2219_s11   ;;  %s1331_s10 = sphi %s1375_s10, %s2218_s10   ;;  %s1327_s9 = sphi %s1373_s9, %s2217_s9  }
   0x9   : > { %s33_s17 = sadd.s32 1, %s1343_s13  ;;  %s42_s18 = sadd.s32 1, %s1335_s11 }
   0xa   : > { %p35_p0 = scmp.ge.s32.totalorder %s33_s17, 2  ;;  %p49_p1 = scmp.ne.s32.totalorder %s1335_s11, %s1331_s10 }
   0xb   : > { %p50_p2 = scmp.eq.s32.totalorder %s1347_s14, 0  ;;  %p55_p3 = scmp.ne.s32.totalorder %s1331_s10, %s1327_s9 }
   0xc   : > { %s2223_s17 = smov (%p35_p0, %s33_s17), 0  ;;  %p56_p5 = scmp.eq.s32.totalorder %s1099_s15, 0 }
   0xd   : > { %p1414_p4 = por %p50_p2, %p49_p1  ;;  %s37_s20 = ssub.s32 %s1343_s13, %s2223_s17 }
   0xe   : > { %p107_p6 = scmp.eq.s32.totalorder %s1099_s15, 1  ;;  %p40_p7 = scmp.eq.s32.totalorder %s37_s20, 0 }
   0xf   : > { %p1420_p8 = por %p56_p5, %p55_p3  ;;  %p113_p10 = scmp.eq.s32.totalorder %s1100_s16, 1 }
  0x10   : > { %p1424_p9 = por %p107_p6, %p49_p1  ;;  %p1102_p12 = scmp.ge.s32.totalorder %s1347_s14, 2 }
  0x11   : > { %s1429_s23 = scalar_select %p40_p7, %s1335_s11, %s42_s18  }
  0x12   : > { %p1431_p11 = por %p113_p10, %p55_p3  ;;  %p1138_p13 = scmp.lt.s32.totalorder %s1347_s14, 2 }
  0x13   : > { %s1438_s25 = sand.u32 1, %s1335_s11   ;;  %s1118_s27 = sshll.u32 %s1343_s13, 6 }
  0x14   : > { %s1103_s26 = sshll.u32 %s1438_s25, 6  ;;  %s145_s30 = scalar_lea.hbm %s2185_s0, %s1118_s27 }
  0x15   : > { %s137_s3 = scalar_lea.vmem [#allocation3], %s1103_s26  ;;  %s146_s5 = sshll.u32 %s145_s30, 4  ;;  %s147_s5 = int_to_ptr.hbm [resolvable:$true] %s146_s5 }
  0x16   : > { %s148_s4 = sshll.u32 %s137_s3, 4  ;;  %p1447_p0 = pnand %p1138_p13, %p1414_p4  ;;  %s149_s4 = int_to_ptr.vmem [resolvable:$true] %s148_s4 }
  0x17   : > { %p1109_p1 = scmp.ge.s32.totalorder %s1347_s14, 1  ;;  %s134_s7 = scalar_lea.sflag [#allocation4], %s1438_s25 }
  0x18   : > { %s1349_s8 = smov 128   ;;  %s1350_s15 = smov 8  }
  0x19   : > { %1130 = dma.hbm_to_vmem [thread:$0]  (!%p1447_p0), %s147_s5, 1024, %s149_s4, %s134_s7, %s1349_s8, %s1349_s8, %s1350_s15  }
  0x1a   : > { %p178_p2 = scmp.lt.s32.totalorder %s1347_s14, 3  ;;  %s1106_s16 = sshll.u32 %s1438_s25, 4 }
  0x1b   : > { %s1119_s18 = sshll.u32 %s1343_s13, 4  ;;  %s162_s27 = scalar_lea.vmem [#allocation6], %s1106_s16 }
  0x1c   : > { %p179_p3 = pnand %p1109_p1, %p178_p2  ;;  %s167_s19 = scalar_lea.hbm %s2186_s1, %s1119_s18 }
  0x1d   : > { %s170_s28 = sshll.u32 %s162_s27, 4  ;;  %s168_s29 = sshll.u32 %s167_s19, 4  ;;  %s171_s28 = int_to_ptr.vmem [resolvable:$true] %s170_s28  ;;  %s169_s29 = int_to_ptr.hbm [resolvable:$true] %s168_s29 }
  0x1e   : > { %s159_s30 = scalar_lea.sflag [#allocation7], %s1438_s25  ;;  %182 = sbr.rel (%p179_p3) target bundleno = 637 (0x27d), region = 28 }
  0x1f   : > { %1133 = dma.hbm_to_vmem [thread:$0]  (!%p1447_p0), %s169_s29, 256, %s171_s28, %s159_s30, %s1349_s8, %s1349_s8, %s1350_s15  }
  0x23   : > { %s1465_s3 = sand.u32 1, %s1331_s10  }
  0x24   : > { %s1110_s4 = sshll.u32 %s1465_s3, 6  ;;  %s185_s5 = scalar_lea.sflag [#allocation4], %s1465_s3 }
  0x25   : > { %s1469_s7 = scalar_lea.vmem [#allocation3], %s1110_s4 }
  0x26   : > { %1314 = dma.done.wait (%p1420_p8), %s185_s5, 1024  }
  0x27   : > { %1316 = vsyncadd (%p1420_p8), %s185_s5, 4294966272  ;;  %s1111_s25 = sshll.u32 %s1465_s3, 4  ;;  %s195_s6 = scalar_lea.sflag [#allocation7], %s1465_s3 }
  0x28   : > { %s1479_s8 = scalar_lea.vmem [#allocation6], %s1111_s25 }
  0x29   : > { %1318 = dma.done.wait (%p1420_p8), %s195_s6, 256  }
  0x2a   : > { %1320 = vsyncadd (%p1420_p8), %s195_s6, 4294967040  ;;  %vm237_vm0 = vcmask 146432   ;;  %v1351_v0 = vmov -inf   ;;  %v1486_v1 = vld [vmem:[%s1469_s7 + $0x10] sm:$0xff]  ;;  %v1489_v2 = vld [vmem:[%s1469_s7] sm:$0xff]  ;;  %s1352_s21 = smov 1   ;;  %v2188_v61 = vlaneseq }
  0x2b   : > { %245 = vst.msk [vmem:[#allocation2 + $0x30] sm:$0xff] %vm237_vm0, %v1351_v0  ;;  %263 = vrot.lane.b32.xlu1 %v1486_v1, %s1352_s21  ;;  %259 = vrot.lane.b32.xlu0 %v1489_v2, %s1352_s21  ;;  %v1496_v3 = vld [vmem:[%s1469_s7 + $0x20] sm:$0xff]  ;;  %v1501_v4 = vld [vmem:[%s1469_s7 + $0x18] sm:$0xff]  ;;  %v1522_v9 = vmul.f32 2.0, %v1486_v1  ;;  %v1534_v11 = vmul.f32 2.0, %v1489_v2  ;;  %vm240_vm1 = vcmask 140288  }
  0x2c   : > { %246 = vst.msk [vmem:[#allocation2 + $0x38] sm:$0xff] %vm237_vm0, %v1351_v0  ;;  %267 = vrot.lane.b32.xlu2 %v1496_v3, %s1352_s21  ;;  %v1504_v5 = vld [vmem:[%s1469_s7 + $0x8] sm:$0xff]  ;;  %v1516_v7 = vld [vmem:[%s1469_s7 + $0x38] sm:$0xff]  ;;  %v1519_v8 = vld [vmem:[%s1469_s7 + $0x30] sm:$0xff]  ;;  %vm283_vm2 = vcmask 138248   ;;  %s1353_s15 = smov 127  }
  0x2d   : > { %238 = vst.msk [vmem:[#allocation2] sm:$0xff] %vm237_vm0, %v1351_v0  ;;  %v1507_v6 = vld [vmem:[%s1469_s7 + $0x28] sm:$0xff]  ;;  %v1531_v10 = vmul.f32 2.0, %v1504_v5  ;;  %s1354_s16 = smov 126   ;;  %v1673_v46 = vmul.f32 2.0, %v1496_v3  ;;  %v1686_v50 = vmul.f32 2.0, %v1516_v7 }
  0x2e   : > { %239 = vst.msk [vmem:[#allocation2 + $0x8] sm:$0xff] %vm237_vm0, %v1351_v0  ;;  %v630_v51 = vmul.f32 2.0, %v1507_v6  ;;  %v1690_v52 = vmul.f32 2.0, %v1501_v4  ;;  %v1700_v56 = vmul.f32 2.0, %v1519_v8  ;;  %v1706_v63 = vand.u32 127, %v2188_v61  ;;  %s2121_s18 = scalar_lea.vmem [#allocation8], %s1111_s25 }
  0x2f   : > { %242 = vst.msk [vmem:[#allocation2 + $0x18] sm:$0xff] %vm237_vm0, %v1351_v0  ;;  %s1120_s20 = sshll.u32 %s1339_s12, 4  ;;  %s986_s12 = sshll.u32 %s2121_s18, 4  ;;  %s987_s12 = int_to_ptr.vmem [resolvable:$true] %s986_s12 }
  0x30   : > { %243 = vst.msk [vmem:[#allocation2 + $0x20] sm:$0xff] %vm237_vm0, %v1351_v0  ;;  %vm551_vm3 = vcmp.eq.s32.totalorder %v1706_v63, 0  ;;  %vm552_vm4 = vcmp.eq.s32.totalorder %v1706_v63, 15  ;;  %s985_s27 = scalar_lea.hbm %s2187_s2, %s1120_s20  ;;  %s971_s29 = scalar_lea.sflag [#allocation5], %s1465_s3 }
  0x31   : > { %248 = vst.msk [vmem:[#allocation2 + $0x48] sm:$0xff] %vm237_vm0, %v1351_v0  ;;  %s988_s28 = sshll.u32 %s985_s27, 4  ;;  %s1281_s25 = scalar_lea.hbm %s2187_s2, 32  ;;  %s989_s28 = int_to_ptr.hbm [resolvable:$true] %s988_s28 }
  0x32   : > { %249 = vst.msk [vmem:[#allocation2 + $0x50] sm:$0xff] %vm237_vm0, %v1351_v0  ;;  %s1275_s30 = sshra.s32 %s989_s28, 4  ;;  %s1276_s30 = int_to_ptr.hbm [resolvable:$true] %s1275_s30 }
  0x33   : > { %2196 = vst [vmem:[#allocation12_spill] sm:$0xff] %v1504_v5  ;;  %265 = vrot.lane.b32.xlu1 %v1501_v4, %s1352_s21  ;;  %261 = vrot.lane.b32.xlu0 %v1504_v5, %s1352_s21  ;;  %s1277_s4 = scalar_lea.hbm %s1276_s30, 16  ;;  %p1282_p7 = scmp.lt.s32.totalorder %s1276_s30, %s2187_s2 }
  0x34   : > { %269 = vrot.lane.b32.xlu2 %v1507_v6, %s1352_s21  ;;  %247 = vst.msk [vmem:[#allocation2 + $0x40] sm:$0x3] %vm240_vm1, %v1351_v0  ;;  %p1278_p4 = scmp.ne.s32.totalorder %s1276_s30, %s1277_s4  ;;  %p1283_p8 = scmp.lt.s32.totalorder %s1281_s25, %s1277_s4 }
  0x35   : > { %241 = vst.msk [vmem:[#allocation2 + $0x10] sm:$0x3] %vm240_vm1, %v1351_v0 }
  0x36   : > { %244 = vst.msk [vmem:[#allocation2 + $0x28] sm:$0x3] %vm240_vm1, %v1351_v0  ;;  %p1279_p5 = pnand %p1278_p4, %p1424_p9  ;;  %p1284_p10 = por %p1283_p8, %p1282_p7 }
  0x37   : > { %250 = vst.msk [vmem:[#allocation2 + $0x58] sm:$0x3] %vm240_vm1, %v1351_v0 }
  0x38   : > { %p1280_p6 = pneg %p1279_p5 }
  0x3a   : > { %p1285_p13 = pnand %p1284_p10, %p1280_p6 }
  0x3b   : > { %273 = vrot.lane.b32.xlu1 %v1516_v7, %s1352_s21  ;;  %271 = vrot.lane.b32.xlu0 %v1519_v8, %s1352_s21 }
  0x3c   : > { %645 = vrot.lane.b32.xlu2 %v1522_v9, %s1352_s21 }
  0x43   : > { %643 = vrot.lane.b32.xlu1 %v1531_v10, %s1352_s21  ;;  %641 = vrot.lane.b32.xlu0 %v1534_v11, %s1352_s21 }
  0x86   : > { %v268_v12 = vpop.permute.xlu2 %267 }
  0x87   : > { %288 = vst.msk [vmem:[#allocation2 + $0x31] sm:$0xff] %vm283_vm2, %v268_v12 }
  0x8e   : > { %v270_v13 = vpop.permute.xlu2 %269  ;;  %v1574_v27 = vld [vmem:[#allocation2 + $0x30] sm:$0xff] }
  0x8f   : > { %289 = vst.msk [vmem:[#allocation2 + $0x39] sm:$0xff] %vm283_vm2, %v270_v13  ;;  %v1616_v37 = vld [vmem:[#allocation2 + $0x31] sm:$0xff] }
  0x96   : > { %v1554_v22 = vld [vmem:[#allocation2 + $0x38] sm:$0xff]  ;;  %v1656_v42 = vpop.permute.xlu2 %645 }
  0x97   : > { %v1598_v33 = vld [vmem:[#allocation2 + $0x32] sm:$0xff]  ;;  %v1610_v36 = vld [vmem:[#allocation2 + $0x3a] sm:$0xff] }
  0x98   : > { %v1630_v40 = vld [vmem:[#allocation2 + $0x39] sm:$0xff] }
  0x9d   : > { %v264_v14 = vpop.permute.xlu1 %263  ;;  %v260_v15 = vpop.permute.xlu0 %259 }
  0x9e   : > { %286 = vst.msk [vmem:[#allocation2 + $0x19] sm:$0xff] %vm283_vm2, %v264_v14 }
  0x9f   : > { %284 = vst.msk [vmem:[#allocation2 + $0x1] sm:$0xff] %vm283_vm2, %v260_v15 }
  0xa5   : > { %v266_v16 = vpop.permute.xlu1 %265  ;;  %v262_v17 = vpop.permute.xlu0 %261  ;;  %v1544_v18 = vld [vmem:[#allocation2 + $0x18] sm:$0xff] }
  0xa6   : > { %287 = vst.msk [vmem:[#allocation2 + $0x21] sm:$0xff] %vm283_vm2, %v266_v16  ;;  %328 = vrot.lane.b32.xlu1 %v1544_v18, %s1353_s15  ;;  %v1549_v19 = vld [vmem:[#allocation2] sm:$0xff] }
  0xa7   : > { %285 = vst.msk [vmem:[#allocation2 + $0x9] sm:$0xff] %vm283_vm2, %v262_v17  ;;  %324 = vrot.lane.b32.xlu2 %v1549_v19, %s1353_s15  ;;  %v1620_v38 = vld [vmem:[#allocation2 + $0x19] sm:$0xff]  ;;  %v1622_v39 = vld [vmem:[#allocation2 + $0x1] sm:$0xff] }
  0xad   : > { %v274_v20 = vpop.permute.xlu1 %273  ;;  %v272_v21 = vpop.permute.xlu0 %271  ;;  %v1556_v23 = vld [vmem:[#allocation2 + $0x20] sm:$0xff] }
  0xae   : > { %291 = vst.msk [vmem:[#allocation2 + $0x51] sm:$0xff] %vm283_vm2, %v274_v20  ;;  %334 = vrot.lane.b32.xlu1 %v1554_v22, %s1353_s15  ;;  %v1561_v24 = vld [vmem:[#allocation2 + $0x8] sm:$0xff]  ;;  %v1594_v32 = vld [vmem:[#allocation2 + $0x1a] sm:$0xff]  ;;  %v571_v20 = vsel %vm551_vm3, 0.0, %v1620_v38 }
  0xaf   : > { %290 = vst.msk [vmem:[#allocation2 + $0x49] sm:$0xff] %vm283_vm2, %v272_v21  ;;  %330 = vrot.lane.b32.xlu2 %v1556_v23, %s1353_s15  ;;  %326 = vrot.lane.b32.xlu0 %v1561_v24, %s1353_s15  ;;  %v1568_v25 = vld [vmem:[#allocation2 + $0x2] sm:$0xff]  ;;  %v1584_v30 = vld [vmem:[#allocation2 + $0xa] sm:$0xff] }
  0xb0   : > { %v1582_v29 = vld [vmem:[#allocation2 + $0x22] sm:$0xff] }
  0xb1   : > { %v1604_v34 = vld [vmem:[#allocation2 + $0x9] sm:$0xff]  ;;  %v1632_v41 = vld [vmem:[#allocation2 + $0x21] sm:$0xff] }
  0xb5   : > { %v1608_v35 = vld [vmem:[#allocation2 + $0x52] sm:$0xff]  ;;  %v1683_v48 = vpop.permute.xlu1 %643  ;;  %v1697_v54 = vpop.permute.xlu0 %641 }
  0xb6   : > { %364 = vrot.lane.b32.xlu1 %v1568_v25, %s1353_s15  ;;  %v1572_v26 = vld [vmem:[#allocation2 + $0x48] sm:$0xff]  ;;  %v1580_v28 = vld [vmem:[#allocation2 + $0x50] sm:$0xff] }
  0xb7   : > { %336 = vrot.lane.b32.xlu2 %v1572_v26, %s1353_s15  ;;  %332 = vrot.lane.b32.xlu0 %v1574_v27, %s1353_s15  ;;  %v1592_v31 = vld [vmem:[#allocation2 + $0x4a] sm:$0xff] }
  0xb8   : > { %v1664_v44 = vld [vmem:[#allocation2 + $0x49] sm:$0xff]  ;;  %v1677_v47 = vld [vmem:[#allocation2 + $0x51] sm:$0xff] }
  0xbe   : > { %370 = vrot.lane.b32.xlu1 %v1582_v29, %s1353_s15 }
  0xbf   : > { %366 = vrot.lane.b32.xlu2 %v1584_v30, %s1353_s15  ;;  %338 = vrot.lane.b32.xlu0 %v1580_v28, %s1353_s15 }
  0xc6   : > { %376 = vrot.lane.b32.xlu1 %v1592_v31, %s1353_s15 }
  0xc7   : > { %372 = vrot.lane.b32.xlu2 %v1598_v33, %s1353_s15  ;;  %368 = vrot.lane.b32.xlu0 %v1594_v32, %s1353_s15 }
  0xce   : > { %414 = vrot.lane.b32.xlu1 %v1604_v34, %s1354_s16 }
  0xcf   : > { %378 = vrot.lane.b32.xlu2 %v1608_v35, %s1353_s15  ;;  %374 = vrot.lane.b32.xlu0 %v1610_v36, %s1353_s15 }
  0xd6   : > { %420 = vrot.lane.b32.xlu1 %v1616_v37, %s1354_s16 }
  0xd7   : > { %416 = vrot.lane.b32.xlu2 %v1620_v38, %s1354_s16  ;;  %412 = vrot.lane.b32.xlu0 %v1622_v39, %s1354_s16 }
  0xde   : > { %454 = vrot.lane.b32.xlu1 %v1561_v24, %s1354_s16 }
  0xdf   : > { %422 = vrot.lane.b32.xlu2 %v1630_v40, %s1354_s16  ;;  %418 = vrot.lane.b32.xlu0 %v1632_v41, %s1354_s16 }
  0xe6   : > { %460 = vrot.lane.b32.xlu1 %v1574_v27, %s1354_s16 }
  0xe7   : > { %456 = vrot.lane.b32.xlu2 %v1544_v18, %s1354_s16  ;;  %452 = vrot.lane.b32.xlu0 %v1549_v19, %s1354_s16 }
  0xee   : > { %466 = vrot.lane.b32.xlu1 %v1580_v28, %s1354_s16 }
  0xef   : > { %462 = vrot.lane.b32.xlu2 %v1554_v22, %s1354_s16  ;;  %458 = vrot.lane.b32.xlu0 %v1556_v23, %s1354_s16 }
  0xf6   : > { %496 = vrot.lane.b32.xlu1 %v1594_v32, %s1354_s16 }
  0xf7   : > { %492 = vrot.lane.b32.xlu2 %v1568_v25, %s1354_s16  ;;  %464 = vrot.lane.b32.xlu0 %v1572_v26, %s1354_s16 }
  0xfe   : > { %502 = vrot.lane.b32.xlu1 %v1610_v36, %s1354_s16 }
  0xff   : > { %498 = vrot.lane.b32.xlu2 %v1582_v29, %s1354_s16  ;;  %494 = vrot.lane.b32.xlu0 %v1584_v30, %s1354_s16 }
 0x101   : > { %v325_v43 = vpop.permute.xlu2 %324 }
 0x102   : > { %v348_v0 = vmax.f32 %v1489_v2, %v325_v43 }
 0x106   : > { %424 = vrot.lane.b32.xlu1 %v1664_v44, %s1354_s16 }
 0x107   : > { %504 = vrot.lane.b32.xlu2 %v1592_v31, %s1354_s16  ;;  %500 = vrot.lane.b32.xlu0 %v1598_v33, %s1354_s16 }
 0x109   : > { %v331_v45 = vpop.permute.xlu2 %330 }
 0x10a   : > { %v351_v21 = vmax.f32 %v1501_v4, %v331_v45  ;;  %v574_v45 = vsel %vm551_vm3, 0.0, %v1630_v40 }
 0x10e   : > { %649 = vrot.lane.b32.xlu1 %v1673_v46, %s1352_s21 }
 0x10f   : > { %426 = vrot.lane.b32.xlu2 %v1677_v47, %s1354_s16  ;;  %506 = vrot.lane.b32.xlu0 %v1608_v35, %s1354_s16 }
 0x111   : > { %v337_v49 = vpop.permute.xlu2 %336 }
 0x116   : > { %655 = vrot.lane.b32.xlu1 %v1686_v50, %s1352_s21 }
 0x117   : > { %651 = vrot.lane.b32.xlu2 %v630_v51, %s1352_s21  ;;  %647 = vrot.lane.b32.xlu0 %v1690_v52, %s1352_s21 }
 0x118   : > { %v329_v53 = vpop.permute.xlu1 %328 }
 0x119   : > { %v367_v55 = vpop.permute.xlu2 %366 }
 0x11f   : > { %653 = vrot.lane.b32.xlu0 %v1700_v56, %s1352_s21 }
 0x120   : > { %v335_v57 = vpop.permute.xlu1 %334 }
 0x121   : > { %v373_v58 = vpop.permute.xlu2 %372  ;;  %v327_v59 = vpop.permute.xlu0 %326 }
 0x122   : > { %v349_v60 = vmax.f32 %v1504_v5, %v327_v59  ;;  %v683_v59 = vsub.f32 %v571_v20, %v1522_v9  ;;  %v350_v9 = vmax.f32 %v1486_v1, %v329_v53 }
 0x124   : > { %v389_v62 = vmax.f32 %v349_v60, %v367_v55 }
 0x128   : > { %v365_v12 = vpop.permute.xlu1 %364 }
 0x129   : > { %v1709_v13 = vmax.f32 %v348_v0, %v365_v12  ;;  %v379_v14 = vpop.permute.xlu2 %378  ;;  %v333_v15 = vpop.permute.xlu0 %332 }
 0x12a   : > { %v352_v16 = vmax.f32 %v1496_v3, %v333_v15 }
 0x12c   : > { %v392_v17 = vmax.f32 %v352_v16, %v373_v58  ;;  %v354_v16 = vmax.f32 %v1519_v8, %v337_v49  ;;  %v397_v49 = vmax.f32 %v389_v62, %v1604_v34  ;;  %v569_v62 = vsel %vm551_vm3, 0.0, %v1622_v39 }
 0x130   : > { %v371_v55 = vpop.permute.xlu1 %370 }
 0x131   : > { %v1718_v43 = vmax.f32 %v351_v21, %v371_v55  ;;  %v417_v60 = vpop.permute.xlu2 %416  ;;  %v339_v0 = vpop.permute.xlu0 %338  ;;  %v686_v55 = vsub.f32 %v574_v45, %v630_v51  ;;  %v353_v51 = vmax.f32 %v1507_v6, %v335_v57 }
 0x132   : > { %v579_v3 = vsel %vm552_vm4, 0.0, %v417_v60  ;;  %v355_v58 = vmax.f32 %v1516_v7, %v339_v0 }
 0x133   : > { %v691_v12 = vadd.f32 %v683_v59, %v579_v3  ;;  %v570_v3 = vsel %vm551_vm3, 0.0, %v1604_v34 }
 0x134   : > { %v1724_v15 = vmax.f32 %v355_v58, %v379_v14  ;;  %v682_v53 = vsub.f32 %v570_v3, %v1531_v10  ;;  %v573_v10 = vsel %vm551_vm3, 0.0, %v1616_v37 }
 0x135   : > { %741 = vrot.lane.b32.xlu1 %v691_v12, %s1352_s21 }
 0x138   : > { %v377_v20 = vpop.permute.xlu1 %376 }
 0x139   : > { %v1732_v21 = vmax.f32 %v354_v16, %v377_v20  ;;  %v423_v61 = vpop.permute.xlu2 %422  ;;  %v369_v5 = vpop.permute.xlu0 %368 }
 0x13a   : > { %v582_v7 = vsel %vm552_vm4, 0.0, %v423_v61  ;;  %v390_v14 = vmax.f32 %v350_v9, %v369_v5 }
 0x13b   : > { %v694_v59 = vadd.f32 %v686_v55, %v582_v7  ;;  %v400_v55 = vmax.f32 %v392_v17, %v1616_v37  ;;  %v396_v7 = vmax.f32 %v1709_v13, %v1622_v39  ;;  %v681_v17 = vsub.f32 %v569_v62, %v1534_v11 }
 0x13c   : > { %v398_v0 = vmax.f32 %v390_v14, %v1620_v38  ;;  %v685_v14 = vsub.f32 %v573_v10, %v1673_v46  ;;  %v572_v13 = vsel %vm551_vm3, 0.0, %v1632_v41  ;;  %v2197_v11 = vlaneseq }
 0x13d   : > { %747 = vrot.lane.b32.xlu1 %v694_v59, %s1352_s21 }
 0x13e   : > { %v438_v8 = vmax.f32 %v398_v0, %v417_v60 }
 0x140   : > { %v415_v58 = vpop.permute.xlu1 %414  ;;  %v446_v12 = vmax.f32 %v438_v8, %v1544_v18 }
 0x141   : > { %v437_v5 = vmax.f32 %v397_v49, %v415_v58  ;;  %v578_v38 = vsel %vm552_vm4, 0.0, %v415_v58  ;;  %v1747_v45 = vpop.permute.xlu2 %456  ;;  %v375_v16 = vpop.permute.xlu0 %374  ;;  %v399_v58 = vmax.f32 %v1718_v43, %v1632_v41 }
 0x142   : > { %v690_v9 = vadd.f32 %v682_v53, %v578_v38  ;;  %v1750_v20 = vmax.f32 %v446_v12, %v1747_v45  ;;  %v393_v60 = vmax.f32 %v353_v51, %v375_v16  ;;  %v1786_v38 = vshrl.u32 %v2197_v11, 7 }
 0x143   : > { %v445_v53 = vmax.f32 %v437_v5, %v1561_v24 }
 0x144   : > { %v401_v34 = vmax.f32 %v393_v60, %v1630_v40  ;;  %739 = vrot.lane.b32.xlu0 %v690_v9, %s1352_s21  ;;  %v684_v60 = vsub.f32 %v572_v13, %v1690_v52  ;;  %vm547_vm5 = vcmp.eq.s32.totalorder %v1786_v38, 0 }
 0x145   : > { %vm1801_vm6 = vmor %vm547_vm5, %vm551_vm3 }
 0x146   : > { %v441_v57 = vmax.f32 %v401_v34, %v423_v61  ;;  %vm1812_vm7 = vmor %vm547_vm5, %vm552_vm4 }
 0x148   : > { %v421_v59 = vpop.permute.xlu1 %420  ;;  %v449_v40 = vmax.f32 %v441_v57, %v1554_v22 }
 0x149   : > { %v440_v0 = vmax.f32 %v400_v55, %v421_v59  ;;  %v581_v3 = vsel %vm552_vm4, 0.0, %v421_v59  ;;  %v1767_v8 = vpop.permute.xlu2 %462  ;;  %v413_v61 = vpop.permute.xlu0 %412 }
 0x14a   : > { %v693_v49 = vadd.f32 %v685_v14, %v581_v3  ;;  %v1770_v51 = vmax.f32 %v449_v40, %v1767_v8  ;;  %v436_v37 = vmax.f32 %v396_v7, %v413_v61  ;;  %v577_v39 = vsel %vm552_vm4, 0.0, %v413_v61 }
 0x14b   : > { %v689_v46 = vadd.f32 %v681_v17, %v577_v39  ;;  %v448_v41 = vmax.f32 %v440_v0, %v1574_v27  ;;  %v587_v40 = vsel %vm1801_vm6, 0.0, %v1549_v19  ;;  %v1825_v61 = vadd.s32 8, %v1786_v38 }
 0x14c   : > { %745 = vrot.lane.b32.xlu0 %v693_v49, %s1352_s21  ;;  %v444_v62 = vmax.f32 %v436_v37, %v1549_v19  ;;  %v607_v37 = vsel %vm551_vm3, 0.0, %v1568_v25 }
 0x14d   : > { %737 = vrot.lane.b32.xlu2 %v689_v46, %s1352_s21  ;;  %vm550_vm8 = vcmp.eq.s32.totalorder %v1825_v61, 15 }
 0x14e   : > { %vm1851_vm9 = vmor %vm550_vm8, %vm551_vm3 }
 0x14f   : > { %vm1864_vm10 = vmor %vm550_vm8, %vm552_vm4 }
 0x150   : > { %v1783_v12 = vpop.permute.xlu1 %454 }
 0x151   : > { %v1789_v16 = vmax.f32 %v445_v53, %v1783_v12  ;;  %v493_v9 = vpop.permute.xlu2 %492  ;;  %v419_v34 = vpop.permute.xlu0 %418 }
 0x152   : > { %v439_v10 = vmax.f32 %v399_v58, %v419_v34  ;;  %v580_v57 = vsel %vm552_vm4, 0.0, %v419_v34  ;;  %v617_v46 = vsel %vm552_vm4, 0.0, %v493_v9 }
 0x153   : > { %v692_v5 = vadd.f32 %v684_v60, %v580_v57  ;;  %v599_v60 = vsel %vm1812_vm7, 0.0, %v1747_v45 }
 0x154   : > { %v447_v11 = vmax.f32 %v439_v10, %v1556_v23 }
 0x155   : > { %743 = vrot.lane.b32.xlu2 %v692_v5, %s1352_s21 }
 0x158   : > { %v1805_v52 = vpop.permute.xlu1 %460 }
 0x159   : > { %v1817_v7 = vmax.f32 %v448_v41, %v1805_v52  ;;  %v499_v14 = vpop.permute.xlu2 %498  ;;  %v453_v59 = vpop.permute.xlu0 %452 }
 0x15a   : > { %v476_v0 = vmax.f32 %v444_v62, %v453_v59  ;;  %v597_v3 = vsel %vm1812_vm7, 0.0, %v453_v59  ;;  %v589_v62 = vsel %vm1801_vm6, 0.0, %v1544_v18 }
 0x15b   : > { %v697_v49 = vsub.f32 %v587_v40, %v597_v3  ;;  %v699_v3 = vsub.f32 %v589_v62, %v599_v60  ;;  %v486_v60 = vmax.f32 %v1750_v20, %v1594_v32  ;;  %v602_v62 = vsel %vm552_vm4, 0.0, %v1767_v8 }
 0x15c   : > { %v484_v17 = vmax.f32 %v476_v0, %v1568_v25 }
 0x15d   : > { %v705_v39 = vsub.f32 %v697_v49, %v607_v37  ;;  %v610_v49 = vsel %vm1851_vm9, 0.0, %v1582_v29 }
 0x15e   : > { %v1833_v13 = vmax.f32 %v484_v17, %v493_v9  ;;  %v590_v9 = vsel %vm551_vm3, 0.0, %v1556_v23  ;;  %v576_v17 = vsel %vm551_vm3, 0.0, %v1677_v47 }
 0x15f   : > { %v713_v53 = vadd.f32 %v705_v39, %v617_v46  ;;  %v620_v46 = vsel %vm1864_vm10, 0.0, %v499_v14 }
 0x160   : > { %v1836_v58 = vpop.permute.xlu1 %466 }
 0x161   : > { %v1842_v34 = vpop.permute.xlu2 %504  ;;  %v459_v57 = vpop.permute.xlu0 %458  ;;  %v721_v5 = vmul.f32 0.25, %v713_v53 }
 0x162   : > { %v479_v10 = vmax.f32 %v447_v11, %v459_v57  ;;  %v600_v45 = vsel %vm552_vm4, 0.0, %v459_v57  ;;  %v609_v11 = vsel %vm551_vm3, 0.0, %v1594_v32 }
 0x163   : > { %v700_v40 = vsub.f32 %v590_v9, %v600_v45  ;;  %v769_v0 = vmul.f32 %v721_v5, %v721_v5  ;;  %v592_v5 = vsel %vm551_vm3, 0.0, %v1554_v22  ;;  %v688_v45 = vsub.f32 %v576_v17, %v1686_v50 }
 0x164   : > { %v487_v37 = vmax.f32 %v479_v10, %v1582_v29  ;;  %v707_v10 = vsub.f32 %v699_v3, %v609_v11  ;;  %v702_v11 = vsub.f32 %v592_v5, %v602_v62  ;;  %v612_v5 = vsel %vm1851_vm9, 0.0, %v1610_v36 }
 0x165   : > { %v708_v39 = vsub.f32 %v700_v40, %v610_v49  ;;  %785 = vrot.lane.b32.xlu1 %v769_v0, %s1352_s21  ;;  %v489_v62 = vmax.f32 %v1770_v51, %v1610_v36  ;;  %v588_v51 = vsel %vm551_vm3, 0.0, %v1561_v24 }
 0x166   : > { %v1878_v53 = vmax.f32 %v487_v37, %v499_v14  ;;  %v403_v14 = vmax.f32 %v1724_v15, %v1677_v47  ;;  %v593_v47 = vsel %vm1801_vm6, 0.0, %v1572_v26 }
 0x167   : > { %v716_v57 = vadd.f32 %v708_v39, %v620_v46 }
 0x168   : > { %v497_v9 = vpop.permute.xlu1 %496 }
 0x169   : > { %v1894_v40 = vmax.f32 %v486_v60, %v497_v9  ;;  %v619_v20 = vsel %vm552_vm4, 0.0, %v497_v9  ;;  %v427_v0 = vpop.permute.xlu2 %426  ;;  %v465_v49 = vpop.permute.xlu0 %464  ;;  %v724_v37 = vmul.f32 0.25, %v716_v57  ;;  %v613_v57 = vsel %vm551_vm3, 0.0, %v1592_v31 }
 0x16a   : > { %v443_v39 = vmax.f32 %v403_v14, %v427_v0  ;;  %v584_v3 = vsel %vm552_vm4, 0.0, %v427_v0  ;;  %v603_v50 = vsel %vm1812_vm7, 0.0, %v465_v49  ;;  %v715_v15 = vadd.f32 %v707_v10, %v619_v20 }
 0x16b   : > { %v696_v8 = vadd.f32 %v688_v45, %v584_v3  ;;  %v703_v17 = vsub.f32 %v593_v47, %v603_v50  ;;  %v772_v46 = vmul.f32 %v724_v37, %v724_v37  ;;  %v623_v14 = vsel %vm552_vm4, 0.0, %v1842_v34 }
 0x16c   : > { %v451_v60 = vmax.f32 %v443_v39, %v1580_v28  ;;  %v723_v45 = vmul.f32 0.25, %v715_v15  ;;  %v710_v37 = vsub.f32 %v702_v11, %v612_v5  ;;  %v485_v39 = vmax.f32 %v1789_v16, %v1584_v30 }
 0x16d   : > { %v711_v9 = vsub.f32 %v703_v17, %v613_v57  ;;  %751 = vrot.lane.b32.xlu0 %v696_v8, %s1352_s21  ;;  %791 = vrot.lane.b32.xlu1 %v772_v46, %s1352_s21  ;;  %v598_v3 = vsel %vm552_vm4, 0.0, %v1783_v12  ;;  %v575_v12 = vsel %vm551_vm3, 0.0, %v1664_v44  ;;  %v402_v57 = vmax.f32 %v1732_v21, %v1664_v44 }
 0x16e   : > { %v483_v10 = vmax.f32 %v451_v60, %v1836_v58  ;;  %v771_v46 = vmul.f32 %v723_v45, %v723_v45  ;;  %v698_v60 = vsub.f32 %v588_v51, %v598_v3 }
 0x16f   : > { %v719_v20 = vadd.f32 %v711_v9, %v623_v14  ;;  %v608_v14 = vsel %vm1851_vm9, 0.0, %v1584_v30 }
 0x170   : > { %v503_v0 = vpop.permute.xlu1 %502  ;;  %v706_v5 = vsub.f32 %v698_v60, %v608_v14  ;;  %v491_v60 = vmax.f32 %v483_v10, %v1608_v35 }
 0x171   : > { %v1925_v47 = vmax.f32 %v489_v62, %v503_v0  ;;  %v622_v50 = vsel %vm1864_vm10, 0.0, %v503_v0  ;;  %v495_v15 = vpop.permute.xlu0 %494  ;;  %v727_v8 = vmul.f32 0.25, %v719_v20  ;;  %v687_v62 = vsub.f32 %v575_v12, %v1700_v56 }
 0x172   : > { %v1929_v17 = vmax.f32 %v485_v39, %v495_v15  ;;  %v718_v11 = vadd.f32 %v710_v37, %v622_v50  ;;  %v618_v45 = vsel %vm1864_vm10, 0.0, %v495_v15  ;;  %v488_v0 = vmax.f32 %v1817_v7, %v1598_v33 }
 0x173   : > { %v775_v16 = vmul.f32 %v727_v8, %v727_v8  ;;  %v601_v37 = vsel %vm1812_vm7, 0.0, %v1805_v52  ;;  %v714_v3 = vadd.f32 %v706_v5, %v618_v45  ;;  %v591_v56 = vsel %vm1801_vm6, 0.0, %v1574_v27 }
 0x174   : > { %v726_v9 = vmul.f32 0.25, %v718_v11  ;;  %v701_v51 = vsub.f32 %v591_v56, %v601_v37  ;;  %v604_v12 = vsel %vm552_vm4, 0.0, %v1836_v58  ;;  %v594_v5 = vsel %vm551_vm3, 0.0, %v1580_v28 }
 0x175   : > { %789 = vrot.lane.b32.xlu0 %v771_v46, %s1352_s21  ;;  %797 = vrot.lane.b32.xlu1 %v775_v16, %s1352_s21  ;;  %v722_v55 = vmul.f32 0.25, %v714_v3  ;;  %v611_v46 = vsel %vm551_vm3, 0.0, %v1598_v33  ;;  %v614_v58 = vsel %vm1851_vm9, 0.0, %v1608_v35  ;;  %v1988_v3 = vpop.permute.xlu2 %651 }
 0x176   : > { %v774_v15 = vmul.f32 %v726_v9, %v726_v9  ;;  %v709_v16 = vsub.f32 %v701_v51, %v611_v46  ;;  %v553_v51 = vsel %vm547_vm5, 0.0, %v1549_v19 }
 0x177   : > { %v770_v9 = vmul.f32 %v722_v55, %v722_v55  ;;  %v665_v55 = vsub.f32 %v553_v51, %v1697_v54 }
 0x178   : > { %v425_v20 = vpop.permute.xlu1 %424 }
 0x179   : > { %v442_v44 = vmax.f32 %v402_v57, %v425_v20  ;;  %v583_v21 = vsel %vm552_vm4, 0.0, %v425_v20  ;;  %v501_v39 = vpop.permute.xlu0 %500  ;;  %v673_v46 = vadd.f32 %v665_v55, %v1568_v25  ;;  %v564_v25 = vsel %vm550_vm8, 0.0, %v1582_v29 }
 0x17a   : > { %v695_v50 = vadd.f32 %v687_v62, %v583_v21  ;;  %v1954_v8 = vmax.f32 %v488_v0, %v501_v39  ;;  %v621_v11 = vsel %vm552_vm4, 0.0, %v501_v39  ;;  %v704_v62 = vsub.f32 %v594_v5, %v604_v12 }
 0x17b   : > { %v450_v7 = vmax.f32 %v442_v44, %v1572_v26  ;;  %v717_v14 = vadd.f32 %v709_v16, %v621_v11 }
 0x17c   : > { %749 = vrot.lane.b32.xlu2 %v695_v50, %s1352_s21  ;;  %v712_v20 = vsub.f32 %v704_v62, %v614_v58 }
 0x17d   : > { %v482_v52 = vmax.f32 %v450_v7, %v465_v49  ;;  %795 = vrot.lane.b32.xlu0 %v774_v15, %s1352_s21  ;;  %v725_v10 = vmul.f32 0.25, %v717_v14 }
 0x17f   : > { %v490_v43 = vmax.f32 %v482_v52, %v1592_v31  ;;  %v773_v0 = vmul.f32 %v725_v10, %v725_v10 }
 0x180   : > { %v650_v63 = vpop.permute.xlu1 %649 }
 0x181   : > { %v507_v49 = vpop.permute.xlu0 %506  ;;  %v1973_v57 = vmax.f32 %v490_v43, %v1842_v34 }
 0x182   : > { %v1975_v45 = vmax.f32 %v491_v60, %v507_v49  ;;  %v624_v34 = vsel %vm1864_vm10, 0.0, %v507_v49  ;;  %v666_v60 = vsub.f32 %v1561_v24, %v1683_v48  ;;  %v557_v24 = vsel %vm547_vm5, 0.0, %v1574_v27 }
 0x183   : > { %v720_v37 = vadd.f32 %v712_v20, %v624_v34  ;;  %v1355_v20 = vmov 0  }
 0x184   : > { %787 = vrot.lane.b32.xlu2 %v770_v9, %s1352_s21  ;;  %v562_v9 = vsel %vm550_vm8, 0.0, %v1584_v30 }
 0x185   : > { %v728_v44 = vmul.f32 0.25, %v720_v37  ;;  %v674_v54 = vadd.f32 %v666_v60, %v562_v9  ;;  %v669_v37 = vsub.f32 %v557_v24, %v650_v63 }
 0x187   : > { %v776_v21 = vmul.f32 %v728_v44, %v728_v44  ;;  %v559_v44 = vsel %vm547_vm5, 0.0, %v1572_v26  ;;  %v677_v63 = vadd.f32 %v669_v37, %v1598_v33 }
 0x188   : > { %v1990_v50 = vpop.permute.xlu1 %655 }
 0x189   : > { %v648_v39 = vpop.permute.xlu0 %647 }
 0x18a   : > { %v668_v19 = vsub.f32 %v1556_v23, %v648_v39  ;;  %v555_v23 = vsel %vm547_vm5, 0.0, %v1544_v18 }
 0x18b   : > { %v667_v18 = vsub.f32 %v555_v23, %v1656_v42 }
 0x18c   : > { %793 = vrot.lane.b32.xlu2 %v773_v0, %s1352_s21  ;;  %v676_v10 = vadd.f32 %v668_v19, %v564_v25 }
 0x191   : > { %v654_v56 = vpop.permute.xlu0 %653 }
 0x194   : > { %799 = vrot.lane.b32.xlu2 %v776_v21, %s1352_s21 }
 0x1a7   : > { %v738_v41 = vpop.permute.xlu2 %737  ;;  %v742_v15 = vpop.permute.xlu1 %741 }
 0x1a8   : > { %v761_v11 = vmul.f32 %v738_v41, %v673_v46  ;;  %v817_v43 = vadd.f32 %v738_v41, %v673_v46  ;;  %v671_v41 = vsub.f32 %v559_v44, %v654_v56 }
 0x1aa   : > { %v825_v5 = vmul.f32 %v817_v43, %v817_v43  ;;  %v679_v26 = vadd.f32 %v671_v41, %v1592_v31  ;;  %v672_v31 = vsub.f32 %v1580_v28, %v1990_v50  ;;  %v566_v50 = vsel %vm550_vm8, 0.0, %v1610_v36 }
 0x1af   : > { %v744_v7 = vpop.permute.xlu2 %743  ;;  %v1995_v52 = vpop.permute.xlu1 %747 }
 0x1b0   : > { %v764_v30 = vmul.f32 %v744_v7, %v676_v10  ;;  %v820_v34 = vadd.f32 %v744_v7, %v676_v10 }
 0x1b2   : > { %v828_v55 = vmul.f32 %v820_v34, %v820_v34 }
 0x1b6   : > { %v740_v59 = vpop.permute.xlu0 %739 }
 0x1b7   : > { %v762_v48 = vmul.f32 %v740_v59, %v674_v54  ;;  %v818_v58 = vadd.f32 %v740_v59, %v674_v54 }
 0x1b9   : > { %v826_v51 = vmul.f32 %v818_v58, %v818_v58 }
 0x1be   : > { %v746_v12 = vpop.permute.xlu0 %745 }
 0x1bf   : > { %v765_v56 = vmul.f32 %v746_v12, %v677_v63  ;;  %v821_v43 = vadd.f32 %v746_v12, %v677_v63  ;;  %v670_v12 = vsub.f32 %v1554_v22, %v1988_v3 }
 0x1c1   : > { %v829_v54 = vmul.f32 %v821_v43, %v821_v43  ;;  %v678_v22 = vadd.f32 %v670_v12, %v566_v50 }
 0x1c3   : > { %v822_v34 = vadd.f32 %v1995_v52, %v678_v22 }
 0x1d6   : > { %v750_v16 = vpop.permute.xlu2 %749 }
 0x1d7   : > { %v786_v49 = vpop.permute.xlu1 %785  ;;  %v823_v9 = vadd.f32 %v750_v16, %v679_v26 }
 0x1d8   : > { %v809_v14 = vsub.f32 %v761_v11, %v786_v49  ;;  %v675_v11 = vadd.f32 %v667_v18, %v1594_v32  ;;  %v767_v49 = vmul.f32 %v750_v16, %v679_v26  ;;  %v568_v16 = vsel %vm550_vm8, 0.0, %v1608_v35 }
 0x1d9   : > { %v831_v24 = vmul.f32 %v823_v9, %v823_v9  ;;  %v680_v58 = vadd.f32 %v672_v31, %v568_v16  ;;  %v1199_v9 = vld [vmem:[%s1469_s7 + $0x30] sm:$0xff]  ;;  %v1200_v16 = vld [vmem:[%s1469_s7 + $0x38] sm:$0xff] }
 0x1da   : > { %v833_v62 = vmul.f32 7.2, %v809_v14  ;;  %vm849_vm11 = vcmp.gt.f32.partialorder %v809_v14, 0.0  ;;  %v763_v38 = vmul.f32 %v742_v15, %v675_v11  ;;  %v819_v60 = vadd.f32 %v742_v15, %v675_v11 }
 0x1dc   : > { %vm841_vm12 = vcmp.le.f32.partialorder %v825_v5, %v833_v62  ;;  %v827_v10 = vmul.f32 %v819_v60, %v819_v60 }
 0x1dd   : > { %vm857_vm13 = vmand %vm841_vm12, %vm849_vm11 }
 0x1de   : > { %v865_v0 = vsel %vm857_vm13, 1, %v1355_v20  ;;  %v788_v29 = vpop.permute.xlu2 %787 }
 0x1df   : > { %v792_v21 = vpop.permute.xlu1 %791  ;;  %v752_v27 = vpop.permute.xlu0 %751  ;;  %873 = vrot.lane.b32.xlu0 %v865_v0, %s1353_s15  ;;  %v810_v39 = vsub.f32 %v762_v48, %v788_v29 }
 0x1e0   : > { %v812_v59 = vsub.f32 %v764_v30, %v792_v21  ;;  %v768_v3 = vmul.f32 %v752_v27, %v680_v58  ;;  %v824_v35 = vadd.f32 %v752_v27, %v680_v58  ;;  %v766_v30 = vmul.f32 %v1995_v52, %v678_v22 }
 0x1e1   : > { %v834_v7 = vmul.f32 7.2, %v810_v39  ;;  %vm850_vm14 = vcmp.gt.f32.partialorder %v810_v39, 0.0  ;;  %v830_v39 = vmul.f32 %v822_v34, %v822_v34 }
 0x1e2   : > { %v836_v46 = vmul.f32 7.2, %v812_v59  ;;  %vm852_vm0 = vcmp.gt.f32.partialorder %v812_v59, 0.0  ;;  %v832_v21 = vmul.f32 %v824_v35, %v824_v35 }
 0x1e3   : > { %vm842_vm15 = vcmp.le.f32.partialorder %v826_v51, %v834_v7  ;;  %v2050_v7 = vld [vmem:[%s1479_s8] sm:$0xff] }
 0x1e4   : > { %vm844_vm1 = vcmp.le.f32.partialorder %v828_v55, %v836_v46  ;;  %vm858_vm2 = vmand %vm842_vm15, %vm850_vm14  ;;  %v2065_v46 = vld [vmem:[%s1479_s8 + $0x8] sm:$0xff] }
 0x1e5   : > { %vm860_vm3 = vmand %vm844_vm1, %vm852_vm0  ;;  %v866_v42 = vsel %vm858_vm2, 1, %v1355_v20 }
 0x1e6   : > { %v868_v32 = vsel %vm860_vm3, 1, %v1355_v20  ;;  %875 = vrot.lane.b32.xlu1 %v866_v42, %s1353_s15  ;;  %v794_v33 = vpop.permute.xlu2 %793 }
 0x1e7   : > { %v798_v19 = vpop.permute.xlu1 %797  ;;  %v790_v14 = vpop.permute.xlu0 %789  ;;  %879 = vrot.lane.b32.xlu0 %v868_v32, %s1353_s15  ;;  %v813_v5 = vsub.f32 %v765_v56, %v794_v33 }
 0x1e8   : > { %v815_v62 = vsub.f32 %v767_v49, %v798_v19  ;;  %v811_v15 = vsub.f32 %v763_v38, %v790_v14  ;;  %v1198_v38 = vld [vmem:[%s1469_s7 + $0x28] sm:$0xff] }
 0x1e9   : > { %v837_v25 = vmul.f32 7.2, %v813_v5  ;;  %vm853_vm4 = vcmp.gt.f32.partialorder %v813_v5, 0.0 }
 0x1ea   : > { %v839_v48 = vmul.f32 7.2, %v815_v62  ;;  %v835_v28 = vmul.f32 7.2, %v811_v15  ;;  %vm851_vm6 = vcmp.gt.f32.partialorder %v811_v15, 0.0  ;;  %vm855_vm11 = vcmp.gt.f32.partialorder %v815_v62, 0.0 }
 0x1eb   : > { %vm845_vm5 = vcmp.le.f32.partialorder %v829_v54, %v837_v25 }
 0x1ec   : > { %vm843_vm7 = vcmp.le.f32.partialorder %v827_v10, %v835_v28  ;;  %vm847_vm9 = vcmp.le.f32.partialorder %v831_v24, %v839_v48  ;;  %vm861_vm10 = vmand %vm845_vm5, %vm853_vm4  ;;  %vm526_vm5 = vcmp.eq.f32.partialorder %v1486_v1, %v1894_v40 }
 0x1ed   : > { %vm859_vm12 = vmand %vm843_vm7, %vm851_vm6  ;;  %v869_v23 = vsel %vm861_vm10, 1, %v1355_v20  ;;  %vm536_vm6 = vcmp.eq.f32.partialorder %v1486_v1, %v2050_v7  ;;  %vm534_vm10 = vcmp.eq.f32.partialorder %v1489_v2, %v2050_v7 }
 0x1ee   : > { %v867_v36 = vsel %vm859_vm12, 1, %v1355_v20  ;;  %vm863_vm8 = vmand %vm847_vm9, %vm855_vm11  ;;  %881 = vrot.lane.b32.xlu1 %v869_v23, %s1353_s15  ;;  %v800_v61 = vpop.permute.xlu2 %799  ;;  %vm524_vm9 = vcmp.eq.f32.partialorder %v1489_v2, %v1833_v13  ;;  %v2210_v13 = vld [vmem:[#allocation12_spill] sm:$0xff] }
 0x1ef   : > { %v796_v0 = vpop.permute.xlu0 %795  ;;  %877 = vrot.lane.b32.xlu2 %v867_v36, %s1353_s15  ;;  %v871_v29 = vsel %vm863_vm8, 1, %v1355_v20  ;;  %v816_v37 = vsub.f32 %v768_v3, %v800_v61 }
 0x1f0   : > { %v814_v44 = vsub.f32 %v766_v30, %v796_v0  ;;  %885 = vrot.lane.b32.xlu0 %v871_v29, %s1353_s15 }
 0x1f1   : > { %v840_v27 = vmul.f32 7.2, %v816_v37  ;;  %vm856_vm13 = vcmp.gt.f32.partialorder %v816_v37, 0.0 }
 0x1f2   : > { %v838_v52 = vmul.f32 7.2, %v814_v44  ;;  %vm854_vm15 = vcmp.gt.f32.partialorder %v814_v44, 0.0 }
 0x1f3   : > { %vm848_vm14 = vcmp.le.f32.partialorder %v832_v21, %v840_v27 }
 0x1f4   : > { %vm846_vm0 = vcmp.le.f32.partialorder %v830_v39, %v838_v52  ;;  %vm864_vm1 = vmand %vm848_vm14, %vm856_vm13  ;;  %vm537_vm13 = vcmp.eq.f32.partialorder %v1501_v4, %v2065_v46  ;;  %vm525_vm14 = vcmp.eq.f32.partialorder %v2210_v13, %v1929_v17 }
 0x1f5   : > { %vm862_vm2 = vmand %vm846_vm0, %vm854_vm15  ;;  %v872_v41 = vsel %vm864_vm1, 1, %v1355_v20  ;;  %vm527_vm0 = vcmp.eq.f32.partialorder %v1501_v4, %v1878_v53  ;;  %v1197_v53 = vld [vmem:[%s1469_s7 + $0x20] sm:$0xff] }
 0x1f6   : > { %v870_v59 = vsel %vm862_vm2, 1, %v1355_v20  ;;  %887 = vrot.lane.b32.xlu1 %v872_v41, %s1353_s15 }
 0x1f7   : > { %883 = vrot.lane.b32.xlu2 %v870_v59, %s1353_s15 }
 0x249   : > { %v878_v18 = vpop.permute.xlu2 %877 }
 0x24a   : > { %vm891_vm3 = vcmp.ne.s32.totalorder %v878_v18, 0 }
 0x24b   : > { %vm899_vm7 = vmand %vm526_vm5, %vm891_vm3 }
 0x24c   : > { %vm2060_vm12 = vmand %vm536_vm6, %vm899_vm7 }
 0x251   : > { %v874_v51 = vpop.permute.xlu0 %873  ;;  %v884_v2 = vpop.permute.xlu2 %883 }
 0x252   : > { %vm889_vm4 = vcmp.ne.s32.totalorder %v874_v51, 0  ;;  %vm894_vm7 = vcmp.ne.s32.totalorder %v884_v2, 0 }
 0x253   : > { %vm897_vm11 = vmand %vm524_vm9, %vm889_vm4  ;;  %vm535_vm4 = vcmp.eq.f32.partialorder %v2210_v13, %v2065_v46 }
 0x254   : > { %vm2067_vm8 = vmand %vm534_vm10, %vm897_vm11  ;;  %vm529_vm11 = vcmp.eq.f32.partialorder %v1507_v6, %v1925_v47 }
 0x258   : > { %v876_v11 = vpop.permute.xlu1 %875 }
 0x259   : > { %v880_v1 = vpop.permute.xlu0 %879  ;;  %vm890_vm15 = vcmp.ne.s32.totalorder %v876_v11, 0 }
 0x25a   : > { %vm892_vm1 = vcmp.ne.s32.totalorder %v880_v1, 0  ;;  %vm898_vm2 = vmand %vm525_vm14, %vm890_vm15  ;;  %vm528_vm14 = vcmp.eq.f32.partialorder %v1197_v53, %v1954_v8 }
 0x25b   : > { %vm900_vm3 = vmand %vm527_vm0, %vm892_vm1 }
 0x25c   : > { %vm908_vm5 = vmand %vm537_vm13, %vm900_vm3  ;;  %vm538_vm13 = vcmp.eq.f32.partialorder %v1197_v53, %v2050_v7 }
 0x25d   : > { %vm918_vm6 = vmpackc.low %vm908_vm5, %vm2060_vm12  ;;  %vm539_vm12 = vcmp.eq.f32.partialorder %v1198_v38, %v2065_v46 }
 0x25e   : > { %v919_v17 = vsel %vm918_vm6, 16711935, %v1355_v20  ;;  %vm906_vm9 = vmand %vm535_vm4, %vm898_vm2  ;;  %vm530_vm6 = vcmp.eq.f32.partialorder %v1199_v9, %v1973_v57 }
 0x25f   : > { %v921_v63 = vpack.c.b8 %v919_v17, %v919_v17  ;;  %vm913_vm10 = vmpackc.low %vm906_vm9, %vm2067_vm8  ;;  %vm961_vm9 = vcmask 123904  }
 0x260   : > { %v914_v4 = vsel %vm913_vm10, 16711935, %v1355_v20  ;;  %v882_v26 = vpop.permute.xlu1 %881  ;;  %vm902_vm15 = vmand %vm529_vm11, %vm894_vm7  ;;  %vm540_vm10 = vcmp.eq.f32.partialorder %v1199_v9, %v2050_v7 }
 0x261   : > { %vm922_vm0 = vnez %v921_v63  ;;  %v916_v56 = vpack.c.b8 %v914_v4, %v914_v4  ;;  %vm893_vm1 = vcmp.ne.s32.totalorder %v882_v26, 0  ;;  %vm2099_vm5 = vmand %vm539_vm12, %vm902_vm15 }
 0x262   : > { %v934_v43 = vsel %vm922_vm0, 16843009, %v1355_v20  ;;  %v886_v42 = vpop.permute.xlu0 %885  ;;  %vm901_vm8 = vmand %vm528_vm14, %vm893_vm1  ;;  %vm531_vm14 = vcmp.eq.f32.partialorder %v1200_v16, %v1975_v45 }
 0x263   : > { %v939_v6 = vunpack.c.0.s8 %v934_v43  ;;  %v940_v47 = vunpack.c.1.s8 %v934_v43  ;;  %vm917_vm2 = vnez %v916_v56  ;;  %vm895_vm3 = vcmp.ne.s32.totalorder %v886_v42, 0  ;;  %vm2095_vm4 = vmand %vm538_vm13, %vm901_vm8 }
 0x264   : > { %v933_v49 = vsel %vm917_vm2, 16843009, %v1355_v20  ;;  %vm2106_vm7 = vmand %vm530_vm6, %vm895_vm3  ;;  %vm541_vm13 = vcmp.eq.f32.partialorder %v1200_v16, %v2065_v46 }
 0x265   : > { %v949_v32 = vpack.c.b16 %v939_v6, %v939_v6  ;;  %v951_v33 = vpack.c.b16 %v940_v47, %v940_v47  ;;  %v937_v31 = vunpack.c.0.s8 %v933_v49  ;;  %v938_v19 = vunpack.c.1.s8 %v933_v49  ;;  %vm923_vm11 = vmpackc.low %vm2099_vm5, %vm2095_vm4 }
 0x266   : > { %v924_v15 = vsel %vm923_vm11, 16711935, %v1355_v20  ;;  %vm911_vm12 = vmand %vm540_vm10, %vm2106_vm7 }
 0x267   : > { %v950_v5 = vpack.c.b8 %v949_v32, %v949_v32  ;;  %v952_v12 = vpack.c.b8 %v951_v33, %v951_v33  ;;  %v945_v57 = vpack.c.b16 %v937_v31, %v937_v31  ;;  %v947_v62 = vpack.c.b16 %v938_v19, %v938_v19 }
 0x268   : > { %v888_v54 = vpop.permute.xlu1 %887  ;;  %v926_v45 = vpack.c.b8 %v924_v15, %v924_v15 }
 0x269   : > { %964 = vst.msk [vmem:[%s2121_s18 + $0x4] sm:$0x3] %vm961_vm9, %v950_v5  ;;  %v946_v25 = vpack.c.b8 %v945_v57, %v945_v57  ;;  %v948_v10 = vpack.c.b8 %v947_v62, %v947_v62  ;;  %vm896_vm15 = vcmp.ne.s32.totalorder %v888_v54, 0 }
 0x26a   : > { %965 = vst.msk [vmem:[%s2121_s18 + $0x6] sm:$0x3] %vm961_vm9, %v952_v12  ;;  %vm904_vm0 = vmand %vm531_vm14, %vm896_vm15  ;;  %vm927_vm1 = vnez %v926_v45 }
 0x26b   : > { %962 = vst.msk [vmem:[%s2121_s18] sm:$0x3] %vm961_vm9, %v946_v25  ;;  %vm912_vm8 = vmand %vm541_vm13, %vm904_vm0  ;;  %v935_v24 = vsel %vm927_vm1, 16843009, %v1355_v20 }
 0x26c   : > { %963 = vst.msk [vmem:[%s2121_s18 + $0x2] sm:$0x3] %vm961_vm9, %v948_v10  ;;  %vm928_vm2 = vmpackc.low %vm912_vm8, %vm911_vm12  ;;  %v941_v48 = vunpack.c.0.s8 %v935_v24  ;;  %v942_v28 = vunpack.c.1.s8 %v935_v24 }
 0x26d   : > { %v929_v50 = vsel %vm928_vm2, 16711935, %v1355_v20 }
 0x26e   : > { %v931_v58 = vpack.c.b8 %v929_v50, %v929_v50  ;;  %v953_v22 = vpack.c.b16 %v941_v48, %v941_v48  ;;  %v955_v3 = vpack.c.b16 %v942_v28, %v942_v28 }
 0x270   : > { %vm932_vm3 = vnez %v931_v58  ;;  %v954_v35 = vpack.c.b8 %v953_v22, %v953_v22  ;;  %v956_v23 = vpack.c.b8 %v955_v3, %v955_v3 }
 0x271   : > { %v936_v30 = vsel %vm932_vm3, 16843009, %v1355_v20 }
 0x272   : > { %v943_v34 = vunpack.c.0.s8 %v936_v30  ;;  %v944_v36 = vunpack.c.1.s8 %v936_v30  ;;  %966 = vst.msk [vmem:[%s2121_s18 + $0x8] sm:$0x3] %vm961_vm9, %v954_v35 }
 0x273   : > { %967 = vst.msk [vmem:[%s2121_s18 + $0xa] sm:$0x3] %vm961_vm9, %v956_v23 }
 0x274   : > { %v957_v61 = vpack.c.b16 %v943_v34, %v943_v34  ;;  %v959_v0 = vpack.c.b16 %v944_v36, %v944_v36 }
 0x276   : > { %v958_v29 = vpack.c.b8 %v957_v61, %v957_v61  ;;  %v960_v37 = vpack.c.b8 %v959_v0, %v959_v0 }
 0x278   : > { %968 = vst.msk [vmem:[%s2121_s18 + $0xc] sm:$0x3] %vm961_vm9, %v958_v29 }
 0x279   : > { %969 = vst.msk [vmem:[%s2121_s18 + $0xe] sm:$0x3] %vm961_vm9, %v960_v37 }
 0x27a   : > { %1288 = shalt.err (!%p1285_p13)
}
 0x27b   : > { %s1356_s3 = smov 32   ;;  %s1357_s21 = smov 2  }
 0x27c   : > { %1125 = dma.vmem_to_hbm [thread:$0]  (%p1424_p9), %s987_s12, 256, %s989_s28, %s971_s29, %s1356_s3, %s1356_s3, %s1357_s21  }
 0x27d PF: > { %s1003_s15 = sand.u32 1, %s1327_s9   ;;  %p1135_p0 = pnand %p1102_p12, %p1431_p11 }
 0x27e   : > { %s1004_s16 = scalar_lea.sflag [#allocation5], %s1003_s15 }
 0x27f   : > { %p1136_p1 = pneg %p1135_p0 }
 0x281   : > { %1322 = dma.done.wait (%p1136_p1), %s1004_s16, 256  }
 0x282   : > { %1324 = vsyncadd (%p1136_p1), %s1004_s16, 4294967040  ;;  %s21_s14 = sadd.s32 1, %s1347_s14   ;;  %s2217_s9 = smov %s1331_s10 }
 0x283   : > { %p18_p2 = scmp.ge.s32.totalorder %s21_s14, 4   ;;  %s2218_s10 = smov %s1335_s11 }
 0x284   : > { %s2219_s11 = smov %s1429_s23  ;;  %s2220_s12 = smov %s1343_s13 }
 0x285   : > { %s2221_s13 = smov %s2223_s17  ;;  %20 = sbr.rel (!%p18_p2) target bundleno = 8 (0x8), region = 86 }
 0x28a   :  { %1010 = vsyncpa [#allocation4], 1 }
 0x28b   :  { %1012 = vsyncpa [#allocation4 + $0x1], 1 }
 0x28c   :  { %1013 = vsyncpa [#allocation7], 1 }
 0x28d   :  { %1015 = vsyncpa [#allocation7 + $0x1], 1 }
 0x28e   :  { %1016 = vsyncpa [#allocation5], 1 }
 0x28f   :  { %1018 = vsyncpa [#allocation5 + $0x1], 1 }

</bundles_post_ra>
